<compile_context>
chip_gen: v6e
topology: v6e:2x2x1
jax: 0.10.0
libtpu: 0.0.40
codegen_flags: <defaults>
</compile_context>

<pallas_src>
import jax
import jax.numpy as jnp
from jax import lax
from jax.experimental import pallas as pl
from jax.experimental.pallas import tpu as pltpu


def _round_up(v, m):
    return ((v + m - 1) // m) * m


def _round_down(v, m):
    return (v // m) * m


def _linear_kernel_f32_out(x_ref, w_ref, b_ref, o_ref):
    """Accumulate straight into the (resident, f32) output block."""
    k = pl.program_id(2)

    @pl.when(k == 0)
    def _():
        # Seed the accumulator with the bias (broadcast over the M tile).
        o_ref[...] = jnp.broadcast_to(b_ref[...].astype(jnp.float32), o_ref.shape)

    # x tile (tm, tk) contracted with weight tile (tn, tk) along K: this is
    # x @ W.T for the PyTorch-layout weight with the transpose folded into the
    # MXU contraction (no materialized W.T, no per-tile XLU transpose).
    o_ref[...] += lax.dot_general(
        x_ref[...],
        w_ref[...],
        dimension_numbers=(((1,), (1,)), ((), ())),
        preferred_element_type=jnp.float32,
    )


def _linear_kernel_scratch(x_ref, w_ref, b_ref, o_ref, acc_ref):
    """f32 scratch accumulator path, used when the output dtype is not f32."""
    k = pl.program_id(2)

    @pl.when(k == 0)
    def _():
        acc_ref[...] = jnp.broadcast_to(b_ref[...].astype(jnp.float32), acc_ref.shape)

    acc_ref[...] += lax.dot_general(
        x_ref[...],
        w_ref[...],
        dimension_numbers=(((1,), (1,)), ((), ())),
        preferred_element_type=jnp.float32,
    )

    @pl.when(k == pl.num_programs(2) - 1)
    def _():
        o_ref[...] = acc_ref[...].astype(o_ref.dtype)


def linear_probe_forward(
    x,
    weight,
    bias,
    *,
    tm=256,
    tn=256,
    tk=2048,
    compute_dtype=jnp.bfloat16,
    out_dtype=None,
):
    """LinearProbe forward: x @ weight.T + bias.

    x:      (batch, input_size)
    weight: (num_classes, input_size)   -- PyTorch nn.Linear convention
    bias:   (num_classes,)
    returns (batch, num_classes) in out_dtype (defaults to x.dtype).
    """
    batch, input_size = x.shape
    num_classes, in2 = weight.shape
    assert in2 == input_size, "weight must be (num_classes, input_size)"
    out_dtype = out_dtype if out_dtype is not None else x.dtype

    # TPU-aligned problem dims: M -> multiple of 8 sublanes; N, K -> 128 lanes.
    Mp = _round_up(batch, 8)
    Np = _round_up(num_classes, 128)
    Kp = _round_up(input_size, 128)

    # Clamp tiles to the padded problem size.
    tm = min(tm, Mp)
    tn = min(tn, Np)
    tk = min(tk, Kp)

    # v7x megacore: if the M axis collapses to a single tile, split N across
    # at least two "parallel" tiles so the second TensorCore has work.
    # (No-op on v5e/v6e: 1 TC per chip.)
    if Mp <= tm and Np >= 256 and Np // tn < 2:
        tn = max(128, _round_down(Np // 2, 128))

    M = _round_up(batch, tm)
    N = _round_up(num_classes, tn)
    K = _round_up(input_size, tk)

    # Feed the MXU in compute_dtype (bf16 by default); accumulation stays f32.
    x_in = x if x.dtype == compute_dtype else x.astype(compute_dtype)
    w_in = weight if weight.dtype == compute_dtype else weight.astype(compute_dtype)

    # Zero padding is exact for a linear layer (padded K columns contribute 0,
    # padded M/N rows/cols are sliced off).  Only pad axes that need it so the
    # aligned case adds zero extra HBM passes.
    if (M != batch) or (K != input_size):
        x_in = jnp.pad(x_in, ((0, M - batch), (0, K - input_size)))
    if (N != num_classes) or (K != input_size):
        w_in = jnp.pad(w_in, ((0, N - num_classes), (0, K - input_size)))
    b_in = bias.astype(jnp.float32)
    if N != num_classes:
        b_in = jnp.pad(b_in, (0, N - num_classes))
    b_in = b_in.reshape(1, N)

    grid = (M // tm, N // tn, K // tk)

    use_scratch = jnp.dtype(out_dtype) != jnp.dtype(jnp.float32)
    kernel = _linear_kernel_scratch if use_scratch else _linear_kernel_f32_out
    scratch_shapes = [pltpu.VMEM((tm, tn), jnp.float32)] if use_scratch else []

    # VMEM budget: double-buffered x/w tiles + double-buffered out tile (+acc),
    # with headroom; capped at 48 MiB so it fits v7x's 64 MiB physical VMEM.
    in_b = jnp.dtype(compute_dtype).itemsize
    out_b = jnp.dtype(out_dtype).itemsize
    footprint = 2 * (tm * tk + tn * tk) * in_b + 2 * tm * tn * out_b + 2 * tn * 4
    if use_scratch:
        footprint += tm * tn * 4
    vmem_limit = int(min(48 << 20, max(2 * footprint, 16 << 20)))

    out = pl.pallas_call(
        kernel,
        out_shape=jax.ShapeDtypeStruct((M, N), out_dtype),
        grid_spec=pltpu.PrefetchScalarGridSpec(
            num_scalar_prefetch=0,
            grid=grid,
            in_specs=[
                pl.BlockSpec((tm, tk), lambda i, j, k: (i, k)),  # x tile
                pl.BlockSpec((tn, tk), lambda i, j, k: (j, k)),  # weight tile (PyTorch layout)
                pl.BlockSpec((1, tn), lambda i, j, k: (0, j)),   # bias (broadcast over M, K)
            ],
            out_specs=pl.BlockSpec((tm, tn), lambda i, j, k: (i, j)),
            scratch_shapes=scratch_shapes,
        ),
        compiler_params=pltpu.CompilerParams(
            dimension_semantics=("parallel", "parallel", "arbitrary"),
            vmem_limit_bytes=vmem_limit,
        ),
    )(x_in, w_in, b_in)

    if (M != batch) or (N != num_classes):
        out = out[:batch, :num_classes]
    return out


if __name__ == "__main__":
    key = jax.random.PRNGKey(0)
    k1, k2, k3, k4, k5, k6 = jax.random.split(key, 6)

    # --- Check 1: the module's small demo shape (8, 32) -> 16 classes --------
    batch, input_size, num_classes = 8, 32, 16
    x = jax.random.normal(k1, (batch, input_size), dtype=jnp.float32)
    bound = 1.0 / (input_size ** 0.5)
    weight = jax.random.uniform(
        k2, (num_classes, input_size), minval=-bound, maxval=bound, dtype=jnp.float32
    )
    bias = jax.random.uniform(
        k3, (num_classes,), minval=-bound, maxval=bound, dtype=jnp.float32
    )

    out = jax.block_until_ready(linear_probe_forward(x, weight, bias))
    ref_f32 = x @ weight.T + bias
    ref_bf16 = (
        jnp.dot(
            x.astype(jnp.bfloat16),
            weight.astype(jnp.bfloat16).T,
            preferred_element_type=jnp.float32,
        )
        + bias
    )
    assert out.shape == (batch, num_classes)
    assert out.dtype == x.dtype
    assert jnp.allclose(out, ref_bf16, atol=1e-3, rtol=1e-3)
    assert jnp.allclose(out, ref_f32, atol=5e-2, rtol=5e-2)

    # --- Check 2: multi-tile (M, N, K) grid, aligned (no-padding) path -------
    b2, d2, c2 = 32, 384, 256
    x2 = jax.random.normal(k4, (b2, d2), dtype=jnp.float32)
    bound2 = 1.0 / (d2 ** 0.5)
    w2 = jax.random.uniform(k5, (c2, d2), minval=-bound2, maxval=bound2, dtype=jnp.float32)
    bb2 = jax.random.uniform(k6, (c2,), minval=-bound2, maxval=bound2, dtype=jnp.float32)

    out2 = jax.block_until_ready(
        linear_probe_forward(x2, w2, bb2, tm=16, tn=128, tk=128)  # grid (2, 2, 3)
    )
    ref2_bf16 = (
        jnp.dot(
            x2.astype(jnp.bfloat16),
            w2.astype(jnp.bfloat16).T,
            preferred_element_type=jnp.float32,
        )
        + bb2
    )
    assert out2.shape == (b2, c2)
    assert jnp.allclose(out2, ref2_bf16, atol=1e-3, rtol=1e-3)
    assert jnp.allclose(out2, x2 @ w2.T + bb2, atol=5e-2, rtol=5e-2)

    print("KERNEL_OK")
</pallas_src>

<mosaic_0001>
module attributes {stable_mosaic.version = 11 : i64} {
  func.func @_linear_kernel_f32_out(%arg0: i32, %arg1: i32, %arg2: i32, %arg3: memref<8x128xbf16, #tpu.memory_space<vmem>>, %arg4: memref<128x128xbf16, #tpu.memory_space<vmem>>, %arg5: memref<1x128xf32, #tpu.memory_space<vmem>>, %arg6: memref<8x128xf32, #tpu.memory_space<vmem>>) attributes {dimension_semantics = [#tpu.dimension_semantics<parallel>, #tpu.dimension_semantics<parallel>, #tpu.dimension_semantics<arbitrary>], iteration_bounds = array<i64: 1, 1, 1>, scalar_prefetch = 0 : i64, scratch_operands = 0 : i64, tpu.core_type = #tpu.core_type<tc>, window_params = [{transform_indices = @transform_0, window_bounds = array<i64: 8, 128>}, {transform_indices = @transform_1, window_bounds = array<i64: 128, 128>}, {transform_indices = @transform_2, window_bounds = array<i64: 1, 128>}, {transform_indices = @transform_3, window_bounds = array<i64: 8, 128>}]} {
    %c0_i32 = arith.constant 0 : i32
    %0 = arith.cmpi eq, %arg2, %c0_i32 : i32
    %1 = arith.extui %0 : i1 to i32
    %c0_i32_0 = arith.constant 0 : i32
    %2 = arith.cmpi ne, %1, %c0_i32_0 : i32
    scf.if %2 {
      %c0_8 = arith.constant 0 : index
      %c0_9 = arith.constant 0 : index
      %9 = vector.load %arg5[%c0_8, %c0_9] : memref<1x128xf32, #tpu.memory_space<vmem>>, vector<1x128xf32>
      %10 = vector.shape_cast %9 : vector<1x128xf32> to vector<1x128xf32>
      %11 = vector.broadcast %10 : vector<1x128xf32> to vector<8x128xf32>
      %c0_10 = arith.constant 0 : index
      %c0_11 = arith.constant 0 : index
      %12 = vector.load %arg6[%c0_10, %c0_11] : memref<8x128xf32, #tpu.memory_space<vmem>>, vector<8x128xf32>
      tpu.vector_store %arg6[%c0_10, %c0_11], %11 {strides = array<i32>} : memref<8x128xf32, #tpu.memory_space<vmem>>, vector<8x128xf32>,
    } else {
    }
    %c0 = arith.constant 0 : index
    %c0_1 = arith.constant 0 : index
    %3 = vector.load %arg6[%c0, %c0_1] : memref<8x128xf32, #tpu.memory_space<vmem>>, vector<8x128xf32>
    %c0_2 = arith.constant 0 : index
    %c0_3 = arith.constant 0 : index
    %4 = vector.load %arg3[%c0_2, %c0_3] : memref<8x128xbf16, #tpu.memory_space<vmem>>, vector<8x128xbf16>
    %c0_4 = arith.constant 0 : index
    %c0_5 = arith.constant 0 : index
    %5 = vector.load %arg4[%c0_4, %c0_5] : memref<128x128xbf16, #tpu.memory_space<vmem>>, vector<128x128xbf16>
    %cst = arith.constant dense<0.000000e+00> : vector<8x128xf32>
    %6 = tpu.matmul %4, %5, %cst {dimension_numbers = #tpu.dot_dimension_numbers<[1], [1], [0], [0], [0, 0, 1, 0], [], []>} : vector<8x128xbf16>, vector<128x128xbf16>, vector<8x128xf32> -> vector<8x128xf32>
    %7 = arith.addf %3, %6 : vector<8x128xf32>
    %c0_6 = arith.constant 0 : index
    %c0_7 = arith.constant 0 : index
    %8 = vector.load %arg6[%c0_6, %c0_7] : memref<8x128xf32, #tpu.memory_space<vmem>>, vector<8x128xf32>
    tpu.vector_store %arg6[%c0_6, %c0_7], %7 {strides = array<i32>} : memref<8x128xf32, #tpu.memory_space<vmem>>, vector<8x128xf32>,
    return
  }
  func.func @transform_0(%arg0: i32, %arg1: i32, %arg2: i32) -> (i32, i32) {
    %c0_i32 = arith.constant 0 : i32
    return %arg0, %arg2 : i32, i32
  }
  func.func @transform_1(%arg0: i32, %arg1: i32, %arg2: i32) -> (i32, i32) {
    %c0_i32 = arith.constant 0 : i32
    return %arg1, %arg2 : i32, i32
  }
  func.func @transform_2(%arg0: i32, %arg1: i32, %arg2: i32) -> (i32, i32) {
    %c0_i32 = arith.constant 0 : i32
    %c0_i32_0 = arith.constant 0 : i32
    return %c0_i32, %arg1 : i32, i32
  }
  func.func @transform_3(%arg0: i32, %arg1: i32, %arg2: i32) -> (i32, i32) {
    %c0_i32 = arith.constant 0 : i32
    return %arg0, %arg1 : i32, i32
  }
}

</mosaic_0001>

<bundles_post_ra>
// kernel: tpu_custom_call.1
= control target key start
LH: loop header
LB: loop body
LE: loop exit
PB: predicated region body
PF: predicated region fallthrough
CT: control target
= control target key end

     0   :  { %8 = vsyncpa [#allocation3], 0  ;;  %s336_s0 = inlined_call_operand.hbm [shape: bf16[8,128], index: 0, kind: input, shape index: {}]   ;;  %s337_s1 = inlined_call_operand.hbm [shape: bf16[128,128], index: 1, kind: input, shape index: {}]   ;;  %s338_s2 = inlined_call_operand.vmem [shape: f32[1,128], index: 2, kind: input, shape index: {}]   ;;  %s339_s3 = inlined_call_operand.hbm [shape: f32[8,128], index: 3, kind: output, shape index: {}]  }
   0x1   :  { %9 = vsyncpa [#allocation6], 0 }
   0x2   :  { %10 = vsyncpa [#allocation4], 0  ;;  %s297_s12 = smov [#allocation2]   ;;  %s298_s14 = smov [#allocation5]  }
   0x3   :  { %s17_s13 = sshll.u32 %s297_s12, 4  ;;  %s26_s15 = sshll.u32 %s298_s14, 4  ;;  %s18_s13 = int_to_ptr.vmem [resolvable:$true] %s17_s13  ;;  %s27_s15 = int_to_ptr.vmem [resolvable:$true] %s26_s15 }
   0x4   :  { %s239_s16 = scalar_lea.vmem %s18_s13, 64  ;;  %p244_p1 = scmp.lt.s32.totalorder %s18_s13, %s18_s13 }
   0x5   :  { %p240_p0 = scmp.ne.s32.totalorder %s18_s13, %s239_s16  ;;  %p245_p2 = scmp.lt.s32.totalorder %s239_s16, %s239_s16 }
   0x7   :  { %p246_p3 = por %p245_p2, %p244_p1 }
   0x9   :  { %p247_p4 = pnand %p246_p3, %p240_p0 }
   0xb   :  { %250 = shalt.err (!%p247_p4)
}
   0xc   :  { %20 = dma.hbm_to_vmem [thread:$0]  %s336_s0, 64, %s18_s13, [#allocation3]  }
   0xd   :  { %s259_s19 = scalar_lea.vmem %s27_s15, 1024  ;;  %p264_p6 = scmp.lt.s32.totalorder %s27_s15, %s27_s15 }
   0xe   :  { %p260_p5 = scmp.ne.s32.totalorder %s27_s15, %s259_s19  ;;  %p265_p7 = scmp.lt.s32.totalorder %s259_s19, %s259_s19 }
  0x10   :  { %p266_p8 = por %p265_p7, %p264_p6 }
  0x12   :  { %p267_p9 = pnand %p266_p8, %p260_p5 }
  0x14   :  { %270 = shalt.err (!%p267_p9)
}
  0x15   :  { %s299_s20 = smov 64   ;;  %s300_s21 = smov 4  }
  0x16   :  { %32 = dma.hbm_to_vmem [thread:$0]  %s337_s1, 1024, %s27_s15, [#allocation6], %s299_s20, %s299_s20, %s300_s21  }
  0x17   :  { %291 = dma.done.wait [#allocation3], 64  }
  0x18   :  { %292 = vsyncadd [#allocation3], 4294967232 }
  0x19   :  { %293 = dma.done.wait [#allocation6], 1024  }
  0x1a   :  { %294 = vsyncadd [#allocation6], 4294966272  ;;  %v301_v0 = vmov 0.0   ;;  %vm302_vm0 = vmmov 0   ;;  %v223_v1 = vld [vmem:[#allocation5 + $0x38] sm:$0xff]   ;;  %v224_v2 = vld [vmem:[#allocation5 + $0x30] sm:$0xff]  }
  0x1b   :  { %196 = vmatprep.subr.bf16.mxu0 %v301_v0  ;;  %212 = vmatprep.mubr.msk.bf16.mxu0 %vm302_vm0, %v301_v0  ;;  %v225_v3 = vld [vmem:[#allocation5 + $0x28] sm:$0xff]   ;;  %v226_v4 = vld [vmem:[#allocation5 + $0x20] sm:$0xff]   ;;  %v227_v5 = vld [vmem:[#allocation5 + $0x18] sm:$0xff]   ;;  %s303_s24 = smov [#allocation7]  }
  0x1c   :  { %197 = vmatpush3.bf16.xpose.msra.mxu0 %v223_v1  ;;  %v228_v6 = vld [vmem:[#allocation5 + $0x10] sm:$0xff]   ;;  %v229_v7 = vld [vmem:[#allocation5 + $0x8] sm:$0xff]   ;;  %v230_v8 = vld [vmem:[#allocation5] sm:$0xff]   ;;  %s168_s25 = sshll.u32 %s303_s24, 4  ;;  %s169_s25 = int_to_ptr.vmem [resolvable:$true] %s168_s25 }
  0x1d   :  { %198 = vmatprep.subr.bf16.mxu0 %v301_v0  ;;  %v55_v9 = vld [vmem:[#allocation2] sm:$0xf]  ;;  %s271_s26 = scalar_lea.vmem %s169_s25, 128  ;;  %p276_p11 = scmp.lt.s32.totalorder %s169_s25, %s169_s25 }
  0x1e   :  { %v178_v10 = vld [vmem:[%s338_s2] ss:$0 sm:$0xff]  ;;  %p272_p10 = scmp.ne.s32.totalorder %s169_s25, %s271_s26  ;;  %p277_p12 = scmp.lt.s32.totalorder %s271_s26, %s271_s26 }
  0x20   :  { %p278_p13 = por %p277_p12, %p276_p11 }
  0x22   :  { %p279_p0 = pnand %p278_p13, %p272_p10 }
  0x24   :  { %199 = vmatpush3.bf16.xpose.msra.mxu0 %v224_v2 }
  0x25   :  { %200 = vmatprep.subr.bf16.mxu0 %v301_v0 }
  0x2c   :  { %201 = vmatpush3.bf16.xpose.msra.mxu0 %v225_v3 }
  0x2d   :  { %202 = vmatprep.subr.bf16.mxu0 %v301_v0 }
  0x34   :  { %203 = vmatpush3.bf16.xpose.msra.mxu0 %v226_v4 }
  0x35   :  { %204 = vmatprep.subr.bf16.mxu0 %v301_v0 }
  0x3c   :  { %205 = vmatpush3.bf16.xpose.msra.mxu0 %v227_v5 }
  0x3d   :  { %206 = vmatprep.subr.bf16.mxu0 %v301_v0 }
  0x44   :  { %207 = vmatpush3.bf16.xpose.msra.mxu0 %v228_v6 }
  0x45   :  { %208 = vmatprep.subr.bf16.mxu0 %v301_v0 }
  0x4c   :  { %209 = vmatpush3.bf16.xpose.msra.mxu0 %v229_v7 }
  0x4d   :  { %210 = vmatprep.subr.bf16.mxu0 %v301_v0 }
  0x54   :  { %211 = vmatpush3.bf16.xpose.msra.mxu0 %v230_v8 }
  0x5b   :  { %213 = vmatmul.mubr.bf16.vlgmr.msra.gmra.mxu0 %v55_v9 }
 0x11b   :  { %v154_v11 = vpop.f32.mrf.mxu0 }
 0x11c   :  { %v160_v12 = vadd.f32 %v178_v10, %v154_v11 }
 0x11d   :  { %v214_v13 = vpop.f32.mrf.mxu0 }
 0x11e   :  { %161 = vst [vmem:[#allocation7] sm:$0xff] %v160_v12 }
 0x11f   :  { %v157_v14 = vpop.f32.mrf.mxu0 }
 0x120   :  { %282 = shalt.err (!%p279_p0)
}
 0x121   :  { %171 = dma.vmem_to_hbm [thread:$0]  %s169_s25, 128, %s339_s3, [#allocation4]   ;;  %v215_v15 = vpop.f32.mrf.mxu0 }
 0x122   :  { %295 = dma.done.wait [#allocation4], 128  }
 0x123   :  { %296 = vsyncadd [#allocation4], 4294967168 }
 0x124   :  { %175 = vsyncpa [#allocation3], 1 }
 0x125   :  { %176 = vsyncpa [#allocation6], 1 }
 0x126   :  { %177 = vsyncpa [#allocation4], 1 }

</bundles_post_ra>
